<compile_context>
chip_gen: v5e
topology: v5e:2x2
jax: 0.10.0
libtpu: 0.0.40
codegen_flags: <defaults>
</compile_context>

<pallas_src>
import functools

import jax
import jax.numpy as jnp
from jax import lax
from jax.experimental import pallas as pl
from jax.experimental.pallas import tpu as pltpu


def _round_up(n, m):
    return ((n + m - 1) // m) * m


def _vmem_budget_and_limit():
    """Generation-aware VMEM budgeting.

    Returns (input_budget, vmem_limit_bytes): double-buffered inputs are kept
    under ~cap/4 (16 MiB on v7x's 64 MiB VMEM, 32 MiB on v5e/v6e's 128 MiB),
    and the scoped VMEM limit is raised accordingly with headroom.
    """
    cap = 64 * 1024 * 1024  # conservative fallback (v7x per-core VMEM)
    try:
        cap = int(pltpu.get_tpu_info().vmem_capacity_bytes)
    except Exception:
        pass
    in_budget = cap // 4
    limit = int(min(cap * 3 // 4, in_budget + (16 << 20)))
    return in_budget, limit


# ---------------------------------------------------------------------------
# shared per-element math
# ---------------------------------------------------------------------------
def _accum_math(x, tgt, valid, *, is_labels, fuse_softmax, chan_axis):
    """x: f32 activations; tgt: int32 labels (broadcastable) if is_labels else
    same-shape soft targets; valid: bool mask broadcastable to x, or None.

    Returns per-element (intersect, denominator) contributions.  The mask is a
    select applied *before* any arithmetic so unspecified OOB tail data (NaN /
    Inf / garbage labels) can never contaminate the sums.
    """
    if valid is not None:
        x = jnp.where(valid, x, 0.0)

    if fuse_softmax:
        # softmax over the channel axis; exp lowers to the EUP (idle slot here)
        m = jnp.max(x, axis=chan_axis, keepdims=True)
        e = jnp.exp(x - m)
        x = e / jnp.sum(e, axis=chan_axis, keepdims=True)
        if valid is not None:
            x = jnp.where(valid, x, 0.0)  # masked columns became 1/C -> re-zero

    if is_labels:
        # fused one-hot without materializing it: y in {0,1} => x*y == where(m, x, 0)
        # and y*y == y, so denominator adds just the mask as 1.0.
        chan = lax.broadcasted_iota(jnp.int32, x.shape, chan_axis)
        onehot = chan == tgt
        if valid is not None:
            onehot = jnp.logical_and(onehot, valid)
        inter = jnp.where(onehot, x, 0.0)
        denom = x * x + onehot.astype(jnp.float32)
    else:
        y = tgt.astype(jnp.float32)
        if valid is not None:
            y = jnp.where(valid, y, 0.0)
        inter = x * y
        denom = x * x + y * y
    return inter, denom


# ---------------------------------------------------------------------------
# kernels
# ---------------------------------------------------------------------------
def _dice_packed_kernel(x_ref, t_ref, inter_ref, denom_ref, *,
                        n_rows, br, kp, nb, is_labels, fuse_softmax):
    """Packed fast path.  x_ref: (C, br, 128); t_ref: (br, 128) int labels or
    (C, br, 128) soft targets.  inter_ref / denom_ref: lane-dense (C, 128) f32
    accumulators resident across the reduction axis."""
    p = pl.program_id(1)
    k = pl.program_id(2)

    @pl.when(k == 0)
    def _():
        inter_ref[...] = jnp.zeros_like(inter_ref)
        denom_ref[...] = jnp.zeros_like(denom_ref)

    def accumulate(valid):
        x = x_ref[...].astype(jnp.float32)                  # (C, br, 128)
        if is_labels:
            tgt = t_ref[...].astype(jnp.int32)[None]        # (1, br, 128)
        else:
            tgt = t_ref[...]                                # (C, br, 128)
        inter_c, denom_c = _accum_math(
            x, tgt, valid, is_labels=is_labels,
            fuse_softmax=fuse_softmax, chan_axis=0)
        # per-lane accumulation: only a sublane reduce per step, no cross-lane
        # reduce and no narrow (C, 1) masked stores in the hot loop.
        inter_ref[...] += jnp.sum(inter_c, axis=1)          # (C, 128)
        denom_ref[...] += jnp.sum(denom_c, axis=1)

    if n_rows % br == 0:
        accumulate(None)          # statically no tail -> zero masking overhead
    else:
        blk = p * kp + k          # global row-block index

        @pl.when(blk != nb - 1)
        def _():
            accumulate(None)      # full blocks never pay for the mask

        @pl.when(blk == nb - 1)
        def _():
            rows = blk * br + lax.broadcasted_iota(jnp.int32, (br, 128), 0)
            accumulate((rows < n_rows)[None])


def _dice_flat_kernel(x_ref, t_ref, inter_ref, denom_ref, *,
                      s_valid, ts, is_labels, fuse_softmax):
    """Fallback path (S % 128 != 0).  x_ref: (C, ts); t_ref: (1, ts) int labels
    or (C, ts) soft targets.  inter_ref / denom_ref: (C, 1) f32 accumulators."""
    k = pl.program_id(1)

    @pl.when(k == 0)
    def _():
        inter_ref[...] = jnp.zeros_like(inter_ref)
        denom_ref[...] = jnp.zeros_like(denom_ref)

    def accumulate(valid):
        x = x_ref[...].astype(jnp.float32)                  # (C, ts)
        tgt = t_ref[...]
        if is_labels:
            tgt = tgt.astype(jnp.int32)                     # (1, ts)
        inter_c, denom_c = _accum_math(
            x, tgt, valid, is_labels=is_labels,
            fuse_softmax=fuse_softmax, chan_axis=0)
        # TODO(synk): per-step cross-lane reduce; the packed path (S%128==0)
        # avoids it - this branch only serves non-128-aligned spatial extents.
        inter_ref[...] += jnp.sum(inter_c, axis=-1, keepdims=True)
        denom_ref[...] += jnp.sum(denom_c, axis=-1, keepdims=True)

    if s_valid % ts == 0:
        accumulate(None)
    else:
        last = pl.num_programs(1) - 1

        @pl.when(k != last)
        def _():
            accumulate(None)

        @pl.when(k == last)
        def _():
            pos = k * ts + lax.broadcasted_iota(jnp.int32, (1, ts), 1)
            accumulate(pos < s_valid)


# ---------------------------------------------------------------------------
# pallas_call wrappers
# ---------------------------------------------------------------------------
def _dice_sums_packed(x3, tgt, *, is_labels, fuse_softmax):
    """x3: (B, C, S) with S % 128 == 0 (kept in model dtype, upcast in-kernel).
    tgt: (B, S) integer labels if is_labels else (B, C, S) soft targets.
    Returns (inter, denom) f32 sums of shape (B, C)."""
    B, C, S = x3.shape
    R = S // 128
    x4 = x3.reshape(B, C, R, 128)          # no-copy reshape (contiguous split)

    in_budget, vmem_limit = _vmem_budget_and_limit()
    x_it = x3.dtype.itemsize
    t_it = tgt.dtype.itemsize
    # double-buffered bytes per 128-lane spatial row across all inputs
    per_row = 2 * 128 * (C * x_it + (t_it if is_labels else C * t_it))
    br_max = max(1, in_budget // per_row)
    if br_max >= R:
        br = R                              # full extent -> always legal
    else:
        br = max(32, (br_max // 32) * 32)   # multiple of 32: safe for any dtype

    nb = pl.cdiv(R, br)                     # total row-blocks
    # feed both v7x TensorCores when B == 1 by splitting the spatial blocks.
    # TODO(synk): odd nb with B == 1 still leaves one v7x core idle.
    P = 2 if (B == 1 and nb >= 2 and nb % 2 == 0) else 1
    kp = nb // P
    grid = (B, P, kp)

    x_spec = pl.BlockSpec((pl.Squeezed(), C, br, 128),
                          lambda b, p, k: (b, 0, p * kp + k, 0))
    if is_labels:
        t_arr = tgt.reshape(B, R, 128)
        t_spec = pl.BlockSpec((pl.Squeezed(), br, 128),
                              lambda b, p, k: (b, p * kp + k, 0))
    else:
        t_arr = tgt.reshape(B, C, R, 128)
        t_spec = pl.BlockSpec((pl.Squeezed(), C, br, 128),
                              lambda b, p, k: (b, 0, p * kp + k, 0))

    out_spec0 = pl.BlockSpec((pl.Squeezed(), pl.Squeezed(), C, 128),
                             lambda b, p, k: (b, p, 0, 0))
    out_spec1 = pl.BlockSpec((pl.Squeezed(), pl.Squeezed(), C, 128),
                             lambda b, p, k: (b, p, 0, 0))

    kernel = functools.partial(_dice_packed_kernel, n_rows=R, br=br, kp=kp,
                               nb=nb, is_labels=is_labels,
                               fuse_softmax=fuse_softmax)
    inter, denom = pl.pallas_call(
        kernel,
        out_shape=(jax.ShapeDtypeStruct((B, P, C, 128), jnp.float32),
                   jax.ShapeDtypeStruct((B, P, C, 128), jnp.float32)),
        grid=grid,
        in_specs=[x_spec, t_spec],
        out_specs=(out_spec0, out_spec1),
        compiler_params=pltpu.CompilerParams(
            dimension_semantics=("parallel", "parallel", "arbitrary"),
            vmem_limit_bytes=vmem_limit),
    )(x4, t_arr)
    # tiny epilogue: fold the parallel split and the 128 lanes
    return inter.sum(axis=(1, 3)), denom.sum(axis=(1, 3))


def _dice_sums_flat(x3, tgt, *, is_labels, fuse_softmax):
    """Fallback for S % 128 != 0 (no HBM pad: tail lanes masked in-kernel).
    x3: (B, C, S); tgt: (B, S) labels or (B, C, S) soft targets."""
    B, C, S = x3.shape
    in_budget, vmem_limit = _vmem_budget_and_limit()
    x_it = x3.dtype.itemsize
    t_it = tgt.dtype.itemsize
    per_lane = 2 * (C * x_it + (t_it if is_labels else C * t_it))
    ts = (in_budget // max(per_lane, 1) // 128) * 128
    ts = max(128, min(ts, _round_up(S, 128)))   # budget decides, no fixed cap
    grid = (B, pl.cdiv(S, ts))

    x_spec = pl.BlockSpec((pl.Squeezed(), C, ts), lambda b, k: (b, 0, k))
    if is_labels:
        t_arr = tgt.reshape(B, 1, S)
        t_spec = pl.BlockSpec((pl.Squeezed(), 1, ts), lambda b, k: (b, 0, k))
    else:
        t_arr = tgt
        t_spec = pl.BlockSpec((pl.Squeezed(), C, ts), lambda b, k: (b, 0, k))

    out_spec0 = pl.BlockSpec((pl.Squeezed(), C, 1), lambda b, k: (b, 0, 0))
    out_spec1 = pl.BlockSpec((pl.Squeezed(), C, 1), lambda b, k: (b, 0, 0))

    kernel = functools.partial(_dice_flat_kernel, s_valid=S, ts=ts,
                               is_labels=is_labels, fuse_softmax=fuse_softmax)
    inter, denom = pl.pallas_call(
        kernel,
        out_shape=(jax.ShapeDtypeStruct((B, C, 1), jnp.float32),
                   jax.ShapeDtypeStruct((B, C, 1), jnp.float32)),
        grid=grid,
        in_specs=[x_spec, t_spec],
        out_specs=(out_spec0, out_spec1),
        compiler_params=pltpu.CompilerParams(
            dimension_semantics=("parallel", "arbitrary"),
            vmem_limit_bytes=vmem_limit),
    )(x3, t_arr)
    return inter[..., 0], denom[..., 0]


# ---------------------------------------------------------------------------
# public forward (matches SoftDiceLossSquared.forward)
# ---------------------------------------------------------------------------
def soft_dice_loss_squared(
    inputs,
    targets,
    loss_mask=None,          # accepted but unused - matches the reference forward
    apply_nonlin=None,
    batch_dice=False,
    do_bg=True,
    smooth=1.0,
):
    """inputs : (B, C, *spatial) float (f32 or bf16)
    targets: either same shape as inputs (soft / one-hot), or integer labels of
             shape (B, *spatial) / (B, 1, *spatial) - any integer dtype (int8
             labels are kept narrow end-to-end to save HBM traffic).
    apply_nonlin: None, the string "softmax" (fused in-kernel softmax over the
             channel axis, saves a full HBM pass), or an arbitrary callable.
    Returns scalar loss 1 - mean(dice)."""
    shp_x = inputs.shape
    B, C = int(shp_x[0]), int(shp_x[1])
    S = 1
    for s in shp_x[2:]:
        S *= int(s)

    fuse_softmax = False
    if apply_nonlin is not None:
        if isinstance(apply_nonlin, str) and apply_nonlin.lower() == "softmax":
            fuse_softmax = True
        else:
            # TODO(synk): arbitrary apply_nonlin callables run as a separate XLA
            # op (one extra HBM round trip); pass apply_nonlin="softmax" to fuse.
            inputs = apply_nonlin(inputs)

    x3 = inputs.reshape(B, C, S)          # keep model dtype; upcast in-kernel

    t = targets
    if t.ndim != inputs.ndim:
        t = t.reshape((t.shape[0], 1) + t.shape[1:])

    if t.shape == inputs.shape:
        is_labels = False
        tt = t.reshape(B, C, S)           # soft / pre-one-hot targets
    else:
        is_labels = True
        tt = t.reshape(B, S)              # integer labels, one-hot fused in-kernel
        if not jnp.issubdtype(tt.dtype, jnp.integer):
            tt = tt.astype(jnp.int32)     # reference does .long()

    if S % 128 == 0:
        inter, denom = _dice_sums_packed(x3, tt, is_labels=is_labels,
                                         fuse_softmax=fuse_softmax)
    else:
        inter, denom = _dice_sums_flat(x3, tt, is_labels=is_labels,
                                       fuse_softmax=fuse_softmax)

    if batch_dice:
        inter = inter.sum(axis=0)
        denom = denom.sum(axis=0)

    dc = 2.0 * (inter + smooth) / (denom + smooth)
    if not do_bg:
        dc = dc[1:] if batch_dice else dc[:, 1:]
    return 1.0 - dc.mean()


# ---------------------------------------------------------------------------
# pure-JAX reference (mirrors the PyTorch module) for sanity checking
# ---------------------------------------------------------------------------
def _reference(inputs, targets, batch_dice=False, do_bg=True, smooth=1.0):
    B, C = inputs.shape[0], inputs.shape[1]
    if targets.ndim != inputs.ndim:
        targets = targets.reshape((targets.shape[0], 1) + targets.shape[1:])
    if targets.shape == inputs.shape:
        y = targets.astype(jnp.float32)
    else:
        y = jax.nn.one_hot(targets[:, 0].astype(jnp.int32), C, axis=1,
                           dtype=jnp.float32)
    x = inputs.astype(jnp.float32)
    axes = tuple(range(2, x.ndim)) if not batch_dice else (0,) + tuple(range(2, x.ndim))
    inter = jnp.sum(x * y, axis=axes) + smooth
    denom = jnp.sum(x * x + y * y, axis=axes) + smooth
    dc = 2.0 * inter / denom
    if not do_bg:
        dc = dc[1:] if batch_dice else dc[:, 1:]
    return 1.0 - dc.mean()


if __name__ == "__main__":
    key = jax.random.PRNGKey(0)
    k1, k2, k3, k4 = jax.random.split(key, 4)

    # --- main case: integer labels, 128-aligned spatial -> packed (sublane-
    #     dense) path with fused one-hot and lane-wide accumulation -----------
    B, C, H, W = 2, 4, 32, 32             # S = 1024 -> packed path
    x = jax.random.normal(k1, (B, C, H, W), dtype=jnp.float32)
    lab = jax.random.randint(k2, (B, 1, H, W), 0, C, dtype=jnp.int32)

    loss = jax.block_until_ready(soft_dice_loss_squared(x, lab))
    ref = jax.block_until_ready(_reference(x, lab))
    assert jnp.allclose(loss, ref, rtol=1e-5, atol=1e-5), (loss, ref)

    # --- int8 labels kept narrow end-to-end (no int32 cast pass) -------------
    loss_i8 = jax.block_until_ready(soft_dice_loss_squared(x, lab.astype(jnp.int8)))
    assert jnp.allclose(loss_i8, ref, rtol=1e-5, atol=1e-5), (loss_i8, ref)

    # --- fused in-kernel softmax over channels (apply_nonlin="softmax") ------
    loss_sm = jax.block_until_ready(
        soft_dice_loss_squared(x, lab, apply_nonlin="softmax"))
    ref_sm = jax.block_until_ready(_reference(jax.nn.softmax(x, axis=1), lab))
    assert jnp.allclose(loss_sm, ref_sm, rtol=1e-4, atol=1e-5), (loss_sm, ref_sm)

    # --- bf16 inputs, soft targets, non-128-divisible spatial (flat path,
    #     no HBM pad, masked tail), batch_dice + no background ----------------
    H2, W2 = 9, 13                        # S = 117 -> flat/masked path
    x2 = jax.random.normal(k3, (B, C, H2, W2), dtype=jnp.bfloat16)
    y2 = jax.nn.softmax(jax.random.normal(k4, (B, C, H2, W2),
                                          dtype=jnp.float32), axis=1)
    loss2 = jax.block_until_ready(
        soft_dice_loss_squared(x2, y2, batch_dice=True, do_bg=False))
    ref2 = jax.block_until_ready(_reference(x2, y2, batch_dice=True, do_bg=False))
    assert jnp.allclose(loss2, ref2, rtol=1e-3, atol=1e-4), (loss2, ref2)

    # --- integer labels on the non-aligned (flat) path ------------------------
    lab2 = jax.random.randint(k2, (B, 1, H2, W2), 0, C, dtype=jnp.int32)
    loss3 = jax.block_until_ready(soft_dice_loss_squared(x2, lab2))
    ref3 = jax.block_until_ready(_reference(x2, lab2))
    assert jnp.allclose(loss3, ref3, rtol=1e-3, atol=1e-4), (loss3, ref3)

    print("KERNEL_OK")
</pallas_src>

<mosaic_0001>
module attributes {stable_mosaic.version = 11 : i64} {
  func.func @_dice_packed_kernel(%arg0: i32, %arg1: i32, %arg2: i32, %arg3: memref<1x4x8x128xf32, #tpu.memory_space<vmem>>, %arg4: memref<1x8x128xi32, #tpu.memory_space<vmem>>, %arg5: memref<1x1x4x128xf32, #tpu.memory_space<vmem>>, %arg6: memref<1x1x4x128xf32, #tpu.memory_space<vmem>>) attributes {dimension_semantics = [#tpu.dimension_semantics<parallel>, #tpu.dimension_semantics<parallel>, #tpu.dimension_semantics<arbitrary>], iteration_bounds = array<i64: 2, 1, 1>, scalar_prefetch = 0 : i64, scratch_operands = 0 : i64, tpu.core_type = #tpu.core_type<tc>, window_params = [{transform_indices = @transform_0, window_bounds = array<i64: 1, 4, 8, 128>}, {transform_indices = @transform_1, window_bounds = array<i64: 1, 8, 128>}, {transform_indices = @transform_2, window_bounds = array<i64: 1, 1, 4, 128>}, {transform_indices = @transform_3, window_bounds = array<i64: 1, 1, 4, 128>}]} {
    %c0_i32 = arith.constant 0 : i32
    %0 = arith.cmpi eq, %arg2, %c0_i32 : i32
    %1 = arith.extui %0 : i1 to i32
    %c0_i32_0 = arith.constant 0 : i32
    %2 = arith.cmpi ne, %1, %c0_i32_0 : i32
    scf.if %2 {
      %cst_25 = arith.constant 0.000000e+00 : f32
      %31 = vector.broadcast %cst_25 : f32 to vector<4x128xf32>
      %c0_26 = arith.constant 0 : index
      %c0_27 = arith.constant 0 : index
      %c0_28 = arith.constant 0 : index
      %c0_29 = arith.constant 0 : index
      %32 = vector.load %arg5[%c0_26, %c0_27, %c0_28, %c0_29] : memref<1x1x4x128xf32, #tpu.memory_space<vmem>>, vector<1x1x4x128xf32>
      %33 = vector.shape_cast %32 : vector<1x1x4x128xf32> to vector<4x128xf32>
      %34 = vector.shape_cast %31 : vector<4x128xf32> to vector<1x1x4x128xf32>
      tpu.vector_store %arg5[%c0_26, %c0_27, %c0_28, %c0_29], %34 {strides = array<i32>} : memref<1x1x4x128xf32, #tpu.memory_space<vmem>>, vector<1x1x4x128xf32>,
      %cst_30 = arith.constant 0.000000e+00 : f32
      %35 = vector.broadcast %cst_30 : f32 to vector<4x128xf32>
      %c0_31 = arith.constant 0 : index
      %c0_32 = arith.constant 0 : index
      %c0_33 = arith.constant 0 : index
      %c0_34 = arith.constant 0 : index
      %36 = vector.load %arg6[%c0_31, %c0_32, %c0_33, %c0_34] : memref<1x1x4x128xf32, #tpu.memory_space<vmem>>, vector<1x1x4x128xf32>
      %37 = vector.shape_cast %36 : vector<1x1x4x128xf32> to vector<4x128xf32>
      %38 = vector.shape_cast %35 : vector<4x128xf32> to vector<1x1x4x128xf32>
      tpu.vector_store %arg6[%c0_31, %c0_32, %c0_33, %c0_34], %38 {strides = array<i32>} : memref<1x1x4x128xf32, #tpu.memory_space<vmem>>, vector<1x1x4x128xf32>,
    } else {
    }
    %c0 = arith.constant 0 : index
    %c0_1 = arith.constant 0 : index
    %c0_2 = arith.constant 0 : index
    %c0_3 = arith.constant 0 : index
    %3 = vector.load %arg3[%c0, %c0_1, %c0_2, %c0_3] : memref<1x4x8x128xf32, #tpu.memory_space<vmem>>, vector<1x4x8x128xf32>
    %4 = vector.shape_cast %3 : vector<1x4x8x128xf32> to vector<4x8x128xf32>
    %c0_4 = arith.constant 0 : index
    %c0_5 = arith.constant 0 : index
    %c0_6 = arith.constant 0 : index
    %5 = vector.load %arg4[%c0_4, %c0_5, %c0_6] : memref<1x8x128xi32, #tpu.memory_space<vmem>>, vector<1x8x128xi32>
    %6 = vector.shape_cast %5 : vector<1x8x128xi32> to vector<8x128xi32>
    %7 = vector.shape_cast %6 : vector<8x128xi32> to vector<1x8x128xi32>
    %8 = tpu.iota {dimensions = array<i32: 0>} : vector<4x8x128xi32>
    %9 = vector.broadcast %7 : vector<1x8x128xi32> to vector<4x8x128xi32>
    %10 = arith.cmpi eq, %8, %9 : vector<4x8x128xi32>
    %cst = arith.constant 0.000000e+00 : f32
    %11 = vector.broadcast %cst : f32 to vector<4x8x128xf32>
    %12 = arith.select %10, %4, %11 : vector<4x8x128xi1>, vector<4x8x128xf32>
    %13 = arith.mulf %4, %4 : vector<4x8x128xf32>
    %14 = arith.extui %10 : vector<4x8x128xi1> to vector<4x8x128xi32>
    %15 = arith.sitofp %14 : vector<4x8x128xi32> to vector<4x8x128xf32>
    %16 = arith.addf %13, %15 : vector<4x8x128xf32>
    %c0_7 = arith.constant 0 : index
    %c0_8 = arith.constant 0 : index
    %c0_9 = arith.constant 0 : index
    %c0_10 = arith.constant 0 : index
    %17 = vector.load %arg5[%c0_7, %c0_8, %c0_9, %c0_10] : memref<1x1x4x128xf32, #tpu.memory_space<vmem>>, vector<1x1x4x128xf32>
    %18 = vector.shape_cast %17 : vector<1x1x4x128xf32> to vector<4x128xf32>
    %cst_11 = arith.constant dense<0.000000e+00> : vector<4x128xf32>
    %19 = vector.multi_reduction <add>, %12, %cst_11 [1] : vector<4x8x128xf32> to vector<4x128xf32>
    %20 = arith.addf %18, %19 : vector<4x128xf32>
    %c0_12 = arith.constant 0 : index
    %c0_13 = arith.constant 0 : index
    %c0_14 = arith.constant 0 : index
    %c0_15 = arith.constant 0 : index
    %21 = vector.load %arg5[%c0_12, %c0_13, %c0_14, %c0_15] : memref<1x1x4x128xf32, #tpu.memory_space<vmem>>, vector<1x1x4x128xf32>
    %22 = vector.shape_cast %21 : vector<1x1x4x128xf32> to vector<4x128xf32>
    %23 = vector.shape_cast %20 : vector<4x128xf32> to vector<1x1x4x128xf32>
    tpu.vector_store %arg5[%c0_12, %c0_13, %c0_14, %c0_15], %23 {strides = array<i32>} : memref<1x1x4x128xf32, #tpu.memory_space<vmem>>, vector<1x1x4x128xf32>,
    %c0_16 = arith.constant 0 : index
    %c0_17 = arith.constant 0 : index
    %c0_18 = arith.constant 0 : index
    %c0_19 = arith.constant 0 : index
    %24 = vector.load %arg6[%c0_16, %c0_17, %c0_18, %c0_19] : memref<1x1x4x128xf32, #tpu.memory_space<vmem>>, vector<1x1x4x128xf32>
    %25 = vector.shape_cast %24 : vector<1x1x4x128xf32> to vector<4x128xf32>
    %cst_20 = arith.constant dense<0.000000e+00> : vector<4x128xf32>
    %26 = vector.multi_reduction <add>, %16, %cst_20 [1] : vector<4x8x128xf32> to vector<4x128xf32>
    %27 = arith.addf %25, %26 : vector<4x128xf32>
    %c0_21 = arith.constant 0 : index
    %c0_22 = arith.constant 0 : index
    %c0_23 = arith.constant 0 : index
    %c0_24 = arith.constant 0 : index
    %28 = vector.load %arg6[%c0_21, %c0_22, %c0_23, %c0_24] : memref<1x1x4x128xf32, #tpu.memory_space<vmem>>, vector<1x1x4x128xf32>
    %29 = vector.shape_cast %28 : vector<1x1x4x128xf32> to vector<4x128xf32>
    %30 = vector.shape_cast %27 : vector<4x128xf32> to vector<1x1x4x128xf32>
    tpu.vector_store %arg6[%c0_21, %c0_22, %c0_23, %c0_24], %30 {strides = array<i32>} : memref<1x1x4x128xf32, #tpu.memory_space<vmem>>, vector<1x1x4x128xf32>,
    return
  }
  func.func @transform_0(%arg0: i32, %arg1: i32, %arg2: i32) -> (i32, i32, i32, i32) {
    %c1_i32 = arith.constant 1 : i32
    %0 = arith.muli %arg1, %c1_i32 : i32
    %1 = arith.addi %0, %arg2 : i32
    %c0_i32 = arith.constant 0 : i32
    %c0_i32_0 = arith.constant 0 : i32
    %c0_i32_1 = arith.constant 0 : i32
    return %arg0, %c0_i32, %1, %c0_i32_0 : i32, i32, i32, i32
  }
  func.func @transform_1(%arg0: i32, %arg1: i32, %arg2: i32) -> (i32, i32, i32) {
    %c1_i32 = arith.constant 1 : i32
    %0 = arith.muli %arg1, %c1_i32 : i32
    %1 = arith.addi %0, %arg2 : i32
    %c0_i32 = arith.constant 0 : i32
    %c0_i32_0 = arith.constant 0 : i32
    return %arg0, %1, %c0_i32 : i32, i32, i32
  }
  func.func @transform_2(%arg0: i32, %arg1: i32, %arg2: i32) -> (i32, i32, i32, i32) {
    %c0_i32 = arith.constant 0 : i32
    %c0_i32_0 = arith.constant 0 : i32
    %c0_i32_1 = arith.constant 0 : i32
    return %arg0, %arg1, %c0_i32, %c0_i32_0 : i32, i32, i32, i32
  }
  func.func @transform_3(%arg0: i32, %arg1: i32, %arg2: i32) -> (i32, i32, i32, i32) {
    %c0_i32 = arith.constant 0 : i32
    %c0_i32_0 = arith.constant 0 : i32
    %c0_i32_1 = arith.constant 0 : i32
    return %arg0, %arg1, %c0_i32, %c0_i32_0 : i32, i32, i32, i32
  }
}

</mosaic_0001>

<bundles_post_ra>
// kernel: tpu_custom_call.1
= control target key start
LH: loop header
LB: loop body
LE: loop exit
PB: predicated region body
PF: predicated region fallthrough
CT: control target
= control target key end

     0   :  { %9 = vsyncpa [#allocation3], 0  ;;  %s1050_s0 = inlined_call_operand.hbm [shape: f32[2,4,8,128], index: 0, kind: input, shape index: {}]   ;;  %s1051_s1 = inlined_call_operand.hbm [shape: s32[2,8,128], index: 1, kind: input, shape index: {}]   ;;  %s1052_s2 = inlined_call_operand.hbm [shape: f32[2,1,4,128], index: 2, kind: output, shape index: {0}]   ;;  %s1053_s3 = inlined_call_operand.hbm [shape: f32[2,1,4,128], index: 3, kind: output, shape index: {1}]  }
   0x1   :  { %11 = vsyncpa [#allocation3 + $0x1], 0 }
   0x2   :  { %12 = vsyncpa [#allocation6], 0 }
   0x3   :  { %14 = vsyncpa [#allocation6 + $0x1], 0 }
   0x4   :  { %15 = vsyncpa [#allocation4], 0 }
   0x5   :  { %17 = vsyncpa [#allocation4 + $0x1], 0 }
   0x6   :  { %18 = vsyncpa [#allocation9], 0 }
   0x7   :  { %20 = vsyncpa [#allocation9 + $0x1], 0  ;;  %s870_s12 = smov 0   ;;  %s872_s13 = smov 0  }
   0x8   :  { %s874_s14 = smov 0   ;;  %s876_s15 = smov 0  }
   0x9   :  { %s878_s16 = smov 0   ;;  %s880_s17 = smov 0  }
   0xa LB: > { %s567_s18 = sadd.s32 4294967295, %s845_s17   ;;  %s568_s19 = sadd.s32 4294967294, %s845_s17   ;;  %s845_s17 = sphi %s880_s17, %s26_s17   ;;  %s841_s16 = sphi %s878_s16, %s1063_s16   ;;  %s837_s15 = sphi %s876_s15, %s1062_s15   ;;  %s833_s14 = sphi %s874_s14, %s1061_s14   ;;  %s829_s13 = sphi %s872_s13, %s1060_s13   ;;  %s825_s12 = sphi %s870_s12, %s1059_s12  }
   0xb   : > { %s45_s20 = sadd.s32 1, %s841_s16  ;;  %s56_s21 = sadd.s32 1, %s833_s14 }
   0xc   : > { %p47_p0 = scmp.ge.s32.totalorder %s45_s20, 2  ;;  %p63_p1 = scmp.ne.s32.totalorder %s833_s14, %s829_s13 }
   0xd   : > { %p64_p2 = scmp.eq.s32.totalorder %s845_s17, 0  ;;  %p69_p3 = scmp.ne.s32.totalorder %s829_s13, %s825_s12 }
   0xe   : > { %s1065_s20 = smov (%p47_p0, %s45_s20), 0  ;;  %p70_p5 = scmp.eq.s32.totalorder %s567_s18, 0 }
   0xf   : > { %p911_p4 = por %p64_p2, %p63_p1  ;;  %s51_s23 = ssub.s32 %s841_s16, %s1065_s20 }
  0x10   : > { %p125_p6 = scmp.eq.s32.totalorder %s567_s18, 1  ;;  %p54_p7 = scmp.eq.s32.totalorder %s51_s23, 0 }
  0x11   : > { %p917_p8 = por %p70_p5, %p69_p3  ;;  %p131_p10 = scmp.eq.s32.totalorder %s568_s19, 1 }
  0x12   : > { %p921_p9 = por %p125_p6, %p63_p1  ;;  %p570_p12 = scmp.ge.s32.totalorder %s845_s17, 2 }
  0x13   : > { %s926_s26 = scalar_select %p54_p7, %s833_s14, %s56_s21  }
  0x14   : > { %p928_p11 = por %p131_p10, %p69_p3  ;;  %p614_p13 = scmp.lt.s32.totalorder %s845_s17, 2 }
  0x15   : > { %s179_s28 = sand.u32 1, %s833_s14   ;;  %s591_s30 = sshll.u32 %s841_s16, 5 }
  0x16   : > { %s571_s29 = sshll.u32 %s179_s28, 5  ;;  %s190_s6 = scalar_lea.hbm %s1050_s0, %s591_s30 }
  0x17   : > { %s183_s7 = scalar_lea.vmem [#allocation2], %s571_s29  ;;  %s191_s9 = sshll.u32 %s190_s6, 4  ;;  %s192_s9 = int_to_ptr.hbm [resolvable:$true] %s191_s9 }
  0x18   : > { %s193_s8 = sshll.u32 %s183_s7, 4  ;;  %p941_p0 = pnand %p614_p13, %p911_p4  ;;  %s194_s8 = int_to_ptr.vmem [resolvable:$true] %s193_s8 }
  0x19   : > { %p576_p1 = scmp.ge.s32.totalorder %s845_s17, 1  ;;  %s180_s11 = scalar_lea.sflag [#allocation3], %s179_s28 }
  0x1a   : > { %s847_s18 = smov 128   ;;  %s848_s19 = smov 8  }
  0x1b   : > { %603 = dma.hbm_to_vmem [thread:$0]  (!%p941_p0), %s192_s9, 512, %s194_s8, %s180_s11, %s847_s18, %s847_s18, %s848_s19  }
  0x1c   : > { %p222_p2 = scmp.lt.s32.totalorder %s845_s17, 3  ;;  %s574_s21 = sshll.u32 %s179_s28, 3 }
  0x1d   : > { %s575_s23 = sshll.u32 %s841_s16, 3  ;;  %s207_s4 = scalar_lea.vmem [#allocation5], %s574_s21 }
  0x1e   : > { %p223_p3 = pnand %p576_p1, %p222_p2  ;;  %s213_s22 = scalar_lea.hbm %s1051_s1, %s575_s23 }
  0x1f   : > { %s217_s5 = sshll.u32 %s207_s4, 4  ;;  %s215_s6 = sshll.u32 %s213_s22, 4  ;;  %s218_s5 = int_to_ptr.vmem [resolvable:$true] %s217_s5  ;;  %s216_s6 = int_to_ptr.hbm [resolvable:$true] %s215_s6 }
  0x20   : > { %s204_s7 = scalar_lea.sflag [#allocation6], %s179_s28  ;;  %226 = sbr.rel (%p223_p3) target bundleno = 79 (0x4f), region = 28 }
  0x21   : > { %606 = dma.hbm_to_vmem [thread:$0]  (!%p941_p0), %s216_s6, 128, %s218_s5, %s204_s7  }
  0x22   : > { %s956_s8 = sand.u32 (!%p223_p3), 1, %s829_s13  }
  0x23   : > { %s577_s9 = sshll.u32 (!%p223_p3), %s956_s8, 5  ;;  %s229_s11 = scalar_lea.sflag (!%p223_p3), [#allocation3], %s956_s8 }
  0x24   : > { %s232_s18 = scalar_lea.vmem (!%p223_p3), [#allocation2], %s577_s9 }
  0x25   : > { %808 = dma.done.wait (%p917_p8), %s229_s11, 512  }
  0x26   : > { %810 = vsyncadd (%p917_p8), %s229_s11, 4294966784  ;;  %s578_s28 = sshll.u32 %s956_s8, 3  ;;  %s239_s10 = scalar_lea.sflag [#allocation6], %s956_s8 }
  0x27   : > { %s242_s19 = scalar_lea.vmem [#allocation5], %s578_s28 }
  0x28   : > { %812 = dma.done.wait (%p917_p8), %s239_s10, 128  }
  0x29   : > { %814 = vsyncadd (%p917_p8), %s239_s10, 4294967168  ;;  %s579_s21 = sshll.u32 %s956_s8, 2  ;;  %v849_v0 = vmov 0.0   ;;  %v284_v1 = vld [vmem:[%s232_s18] sm:$0xff]  ;;  %v285_v2 = vld [vmem:[%s232_s18 + $0x8] sm:$0xff]  ;;  %vm342_vm4 = vcmask 1041409  }
  0x2a   : > { %s971_s23 = scalar_lea.vmem [#allocation7], %s579_s21  ;;  %s974_s29 = scalar_lea.vmem [#allocation8], %s579_s21  ;;  %v286_v3 = vld [vmem:[%s232_s18 + $0x10] sm:$0xff]  ;;  %v288_v4 = vld [vmem:[%s242_s19] sm:$0xff]  ;;  %v297_v5 = vmul.f32 %v284_v1, %v284_v1  ;;  %v298_v6 = vmul.f32 %v285_v2, %v285_v2  ;;  %v287_v12 = vld [vmem:[%s232_s18 + $0x18] sm:$0xff]  ;;  %vm344_vm5 = vcmask 1042434  }
  0x2b   : > { %282 = vst [vmem:[%s971_s23] sm:$0xf] %v849_v0  ;;  %v299_v7 = vmul.f32 %v286_v3, %v286_v3  ;;  %vm289_vm0 = vcmp.eq.s32.totalorder %v288_v4, 0  ;;  %vm290_vm1 = vcmp.eq.s32.totalorder %v288_v4, 1  ;;  %vm291_vm2 = vcmp.eq.s32.totalorder %v288_v4, 2  ;;  %s587_s24 = sshll.u32 %s837_s15, 2  ;;  %s405_s7 = sshll.u32 %s971_s23, 4  ;;  %s406_s7 = int_to_ptr.vmem [resolvable:$true] %s405_s7 }
  0x2c   : > { %283 = vst [vmem:[%s974_s29] sm:$0xf] %v849_v0  ;;  %vm292_vm3 = vcmp.eq.s32.totalorder %v288_v4, 3  ;;  %v293_v8 = vsel %vm289_vm0, %v284_v1, 0.0  ;;  %v294_v9 = vsel %vm290_vm1, %v285_v2, 0.0  ;;  %v581_v10 = vsel %vm289_vm0, 1.0, %v849_v0  ;;  %s403_s4 = scalar_lea.hbm %s1052_s2, %s587_s24  ;;  %s418_s6 = scalar_lea.hbm %s1053_s3, %s587_s24 }
  0x2d   : > { %v582_v11 = vsel %vm290_vm1, 1.0, %v849_v0  ;;  %v583_v13 = vsel %vm291_vm2, 1.0, %v849_v0  ;;  %v584_v14 = vsel %vm292_vm3, 1.0, %v849_v0  ;;  %v309_v15 = vadd.f32 %v581_v10, %v297_v5  ;;  %s407_s9 = sshll.u32 %s403_s4, 4  ;;  %s420_s11 = sshll.u32 %s974_s29, 4  ;;  %s408_s9 = int_to_ptr.hbm [resolvable:$true] %s407_s9  ;;  %s997_s11 = int_to_ptr.vmem [resolvable:$true] %s420_s11 }
  0x2e   : > { %v310_v16 = vadd.f32 %v582_v11, %v298_v6  ;;  %v311_v17 = vadd.f32 %v583_v13, %v299_v7  ;;  %v314_v18 = vrot.slane %v293_v8, 4  ;;  %v320_v19 = vrot.slane %v294_v9, 4  ;;  %s422_s18 = sshll.u32 %s418_s6, 4  ;;  %s387_s28 = scalar_lea.sflag [#allocation4], %s956_s8  ;;  %s999_s18 = int_to_ptr.hbm [resolvable:$true] %s422_s18 }
  0x2f   : > { %v295_v20 = vsel %vm291_vm2, %v286_v3, 0.0  ;;  %v352_v21 = vrot.slane %v309_v15, 4  ;;  %v296_v23 = vsel %vm292_vm3, %v287_v12, 0.0  ;;  %v300_v24 = vmul.f32 %v287_v12, %v287_v12  ;;  %s741_s10 = sshra.s32 %s408_s9, 4  ;;  %s747_s30 = scalar_lea.hbm %s1052_s2, 8  ;;  %s742_s10 = int_to_ptr.hbm [resolvable:$true] %s741_s10 }
  0x30   : > { %v358_v22 = vrot.slane %v310_v16, 4  ;;  %v315_v25 = vadd.f32 %v314_v18, %v293_v8  ;;  %v321_v26 = vadd.f32 %v320_v19, %v294_v9  ;;  %v326_v27 = vrot.slane %v295_v20, 4  ;;  %s743_s19 = scalar_lea.hbm %s742_s10, 4  ;;  %p748_p7 = scmp.lt.s32.totalorder %s742_s10, %s1052_s2 }
  0x31   : > { %v332_v28 = vrot.slane %v296_v23, 4  ;;  %v353_v29 = vadd.f32 %v352_v21, %v309_v15  ;;  %v312_v31 = vadd.f32 %v584_v14, %v300_v24  ;;  %v364_v32 = vrot.slane %v311_v17, 4  ;;  %p744_p4 = scmp.ne.s32.totalorder %s742_s10, %s743_s19  ;;  %p749_p8 = scmp.lt.s32.totalorder %s747_s30, %s743_s19 }
  0x32   : > { %v359_v30 = vadd.f32 %v358_v22, %v310_v16  ;;  %v316_v33 = vrot.slane %v315_v25, 2  ;;  %v322_v34 = vrot.slane %v321_v26, 2  ;;  %v327_v35 = vadd.f32 %v326_v27, %v295_v20  ;;  %v313_v4 = vld [vmem:[%s971_s23] sm:$0xf] }
  0x33   : > { %v333_v36 = vadd.f32 %v332_v28, %v296_v23  ;;  %v354_v37 = vrot.slane %v353_v29, 2  ;;  %v365_v39 = vadd.f32 %v364_v32, %v311_v17  ;;  %v370_v40 = vrot.slane %v312_v31, 4  ;;  %v351_v10 = vld [vmem:[%s974_s29] sm:$0xf]  ;;  %p745_p5 = pnand %p744_p4, %p921_p9  ;;  %p750_p10 = por %p749_p8, %p748_p7 }
  0x34   : > { %v360_v38 = vrot.slane %v359_v30, 2  ;;  %v317_v41 = vadd.f32 %v316_v33, %v315_v25  ;;  %v323_v42 = vadd.f32 %v322_v34, %v321_v26  ;;  %v328_v43 = vrot.slane %v327_v35, 2 }
  0x35   : > { %v334_v44 = vrot.slane %v333_v36, 2  ;;  %v355_v45 = vadd.f32 %v354_v37, %v353_v29  ;;  %v366_v47 = vrot.slane %v365_v39, 2  ;;  %v371_v48 = vadd.f32 %v370_v40, %v312_v31  ;;  %p746_p6 = pneg %p745_p5 }
  0x36   : > { %v361_v46 = vadd.f32 %v360_v38, %v359_v30  ;;  %v318_v49 = vrot.slane %v317_v41, 1  ;;  %v324_v50 = vrot.slane %v323_v42, 1  ;;  %v329_v51 = vadd.f32 %v328_v43, %v327_v35 }
  0x37   : > { %v335_v52 = vadd.f32 %v334_v44, %v333_v36  ;;  %v356_v53 = vrot.slane %v355_v45, 1  ;;  %v367_v55 = vadd.f32 %v366_v47, %v365_v39  ;;  %v372_v56 = vrot.slane %v371_v48, 2  ;;  %p751_p13 = pnand %p750_p10, %p746_p6 }
  0x38   : > { %v362_v54 = vrot.slane %v361_v46, 1  ;;  %v319_v57 = vadd.f32 %v318_v49, %v317_v41  ;;  %v325_v58 = vadd.f32 %v324_v50, %v323_v42  ;;  %v330_v59 = vrot.slane %v329_v51, 1 }
  0x39   : > { %v336_v60 = vrot.slane %v335_v52, 1  ;;  %v357_v61 = vadd.f32 %v356_v53, %v355_v45  ;;  %v368_v63 = vrot.slane %v367_v55, 1  ;;  %v373_v0 = vadd.f32 %v372_v56, %v371_v48 }
  0x3a   : > { %v363_v62 = vadd.f32 %v362_v54, %v361_v46  ;;  %v331_v1 = vadd.f32 %v330_v59, %v329_v51  ;;  %v343_v3 = vsel %vm342_vm4, %v325_v58, %v319_v57  ;;  %vm346_vm6 = vcmask 1043459  }
  0x3b   : > { %v337_v2 = vadd.f32 %v336_v60, %v335_v52  ;;  %v369_v5 = vadd.f32 %v368_v63, %v367_v55  ;;  %v374_v6 = vrot.slane %v373_v0, 1 }
  0x3c   : > { %v380_v7 = vsel %vm342_vm4, %v363_v62, %v357_v61  ;;  %v345_v8 = vsel %vm344_vm5, %v331_v1, %v343_v3 }
  0x3d   : > { %v347_v9 = vsel %vm346_vm6, %v337_v2, %v345_v8  ;;  %v375_v11 = vadd.f32 %v374_v6, %v373_v0  ;;  %v381_v12 = vsel %vm344_vm5, %v369_v5, %v380_v7 }
  0x3e   : > { %v349_v13 = vadd.f32 %v347_v9, %v313_v4 }
  0x3f   : > { %v382_v14 = vsel %vm346_vm6, %v375_v11, %v381_v12 }
  0x40   : > { %350 = vst [vmem:[%s971_s23] sm:$0xf] %v349_v13  ;;  %v384_v15 = vadd.f32 %v382_v14, %v351_v10 }
  0x41   : > { %754 = shalt.err (!%p751_p13)
}
  0x42   : > { %596 = dma.vmem_to_hbm [thread:$0]  (%p921_p9), %s406_s7, 64, %s408_s9, %s387_s28   ;;  %385 = vst [vmem:[%s974_s29] sm:$0xf] %v384_v15 }
  0x43   : > { %s392_s23 = scalar_lea.sflag [#allocation9], %s956_s8  ;;  %s769_s15 = sshra.s32 %s999_s18, 4  ;;  %s770_s15 = int_to_ptr.hbm [resolvable:$true] %s769_s15 }
  0x44   : > { %s771_s5 = scalar_lea.hbm %s770_s15, 4  ;;  %s775_s19 = scalar_lea.hbm %s1053_s3, 8 }
  0x45   : > { %p772_p0 = scmp.ne.s32.totalorder %s770_s15, %s771_s5  ;;  %p776_p3 = scmp.lt.s32.totalorder %s770_s15, %s1053_s3 }
  0x46   : > { %p777_p4 = scmp.lt.s32.totalorder %s775_s19, %s771_s5 }
  0x47   : > { %p773_p1 = pnand %p772_p0, %p921_p9 }
  0x48   : > { %p778_p5 = por %p777_p4, %p776_p3 }
  0x49   : > { %p774_p2 = pneg %p773_p1 }
  0x4b   : > { %p779_p6 = pnand %p778_p5, %p774_p2 }
  0x4d   : > { %782 = shalt.err (!%p779_p6)
}
  0x4e   : > { %597 = dma.vmem_to_hbm [thread:$0]  (%p921_p9), %s997_s11, 64, %s999_s18, %s392_s23  }
  0x4f PF: > { %s434_s8 = sand.u32 1, %s825_s12   ;;  %p608_p7 = pnand %p570_p12, %p928_p11 }
  0x50   : > { %s435_s29 = scalar_lea.sflag [#allocation4], %s434_s8 }
  0x51   : > { %p609_p8 = pneg %p608_p7 }
  0x53   : > { %816 = dma.done.wait (%p609_p8), %s435_s29, 64  }
  0x54   : > { %818 = vsyncadd (%p609_p8), %s435_s29, 4294967232  ;;  %s445_s7 = scalar_lea.sflag [#allocation9], %s434_s8 }
  0x55   : > { %820 = dma.done.wait (%p609_p8), %s445_s7, 64  }
  0x56   : > { %822 = vsyncadd (%p609_p8), %s445_s7, 4294967232  ;;  %s26_s17 = sadd.s32 1, %s845_s17   ;;  %s1059_s12 = smov %s829_s13 }
  0x57   : > { %p23_p10 = scmp.ge.s32.totalorder %s26_s17, 4   ;;  %s1060_s13 = smov %s833_s14 }
  0x58   : > { %s1061_s14 = smov %s926_s26  ;;  %s1062_s15 = smov %s841_s16 }
  0x59   : > { %s1063_s16 = smov %s1065_s20  ;;  %25 = sbr.rel (!%p23_p10) target bundleno = 10 (0xa), region = 107 }
  0x5e   :  { %451 = vsyncpa [#allocation3], 1 }
  0x5f   :  { %453 = vsyncpa [#allocation3 + $0x1], 1 }
  0x60   :  { %454 = vsyncpa [#allocation6], 1 }
  0x61   :  { %456 = vsyncpa [#allocation6 + $0x1], 1 }
  0x62   :  { %457 = vsyncpa [#allocation4], 1 }
  0x63   :  { %459 = vsyncpa [#allocation4 + $0x1], 1 }
  0x64   :  { %460 = vsyncpa [#allocation9], 1 }
  0x65   :  { %462 = vsyncpa [#allocation9 + $0x1], 1 }

</bundles_post_ra>
